<compile_context>
chip_gen: v7x
topology: tpu7x:2x2x1
jax: 0.10.0
libtpu: 0.0.40
codegen_flags: <defaults>
</compile_context>

<pallas_src>
import jax
import jax.numpy as jnp
from jax.experimental import pallas as pl
from jax.experimental.pallas import tpu as pltpu


# ----------------------------------------------------------------------------
# Fused SoftObjAttention kernel (one batch tile per grid step)
# ----------------------------------------------------------------------------
def _soft_obj_attention_kernel(h_ref, win_ref, ctx_ref, w_ref, logit_ref):
    """h_ref     : (TB, 1, Q)   queries for this batch tile
       win_ref   : (Q, C)       linear_in.weight, pre-transposed
       ctx_ref   : (TB*M, K, C) object features, flattened over (batch, cand)
       w_ref     : (TB*M, 1, C) weighted context  (output)
       logit_ref : (TB*M, 1, K) pre-softmax logits (output)"""
    tb = h_ref.shape[0]
    n, _, c = ctx_ref.shape
    m = n // tb

    ctx = ctx_ref[...]                                            # (N, K, C)

    # linear_in: one (TB, Q) @ (Q, C) MXU matmul per tile.
    h = h_ref[...][:, 0, :]                                       # (TB, Q)
    target = jnp.dot(h, win_ref[...],
                     preferred_element_type=jnp.float32)          # (TB, C)

    # repeat_interleave(target, M, dim=0): broadcast along a leading dim and
    # merge leading dims (minor (1, C) layout untouched => free).
    tgt = jnp.broadcast_to(target[:, None, None, :], (tb, m, 1, c))
    tgt = tgt.reshape(n, 1, c).astype(ctx.dtype)                  # (N, 1, C)

    # logits: batched MXU matmul, batch = N, contract C.
    logits = jnp.einsum("nqc,nkc->nqk", tgt, ctx,
                        preferred_element_type=jnp.float32)       # (N, 1, K)
    logit_ref[...] = logits.astype(logit_ref.dtype)

    # TODO(synk): optional `mask` path (masked_fill(-inf) before softmax) is
    # not implemented; the module is exercised here with mask=None.

    # Numerically stable softmax over the K objects.
    mx = jnp.max(logits, axis=-1, keepdims=True)
    e = jnp.exp(logits - mx)
    attn = e / jnp.sum(e, axis=-1, keepdims=True)                 # (N, 1, K)

    # weighted context: batched MXU matmul, batch = N, contract K.
    weighted = jnp.einsum("nqk,nkc->nqc", attn.astype(ctx.dtype), ctx,
                          preferred_element_type=jnp.float32)     # (N, 1, C)
    w_ref[...] = weighted.astype(w_ref.dtype)


def _choose_batch_tile(batch, per_batch_bytes, budget_bytes):
    """Largest divisor of `batch` whose context tile fits the VMEM budget."""
    tb = max(1, min(batch, budget_bytes // max(per_batch_bytes, 1)))
    while batch % tb != 0:
        tb -= 1
    return tb


def soft_obj_attention(h, context, w_in, *, ctx_tile_budget_bytes=8 << 20):
    """h: (B, Q); context: (B, M, K, C); w_in: (C, Q) (torch linear_in.weight).

    Returns (weighted_context (B, M, C), attn_logits (B, M, K))."""
    B, M, K, C = context.shape
    Q = h.shape[-1]
    N = B * M

    ctx_flat = context.reshape(N, K, C)     # merge leading dims: free
    h3 = h.reshape(B, 1, Q)                 # add unit dim: free
    w_in_t = w_in.T                         # (Q, C)

    itemsize = jnp.dtype(context.dtype).itemsize
    per_b = M * K * C * itemsize
    tb = _choose_batch_tile(B, per_b, ctx_tile_budget_bytes)
    tn = tb * M
    grid = (B // tb,)

    # Keep the double-buffered context tile inside the scoped-VMEM default on
    # every chip generation; only raise the limit when one batch element alone
    # is already large (stays below v7x's 64 MiB physical VMEM).
    cp = dict(dimension_semantics=("parallel",))
    need = 2 * tb * per_b + 2 * (Q * C + tb * Q + tn * (C + K)) * 4
    if need > (24 << 20):
        cp["vmem_limit_bytes"] = min(need + (8 << 20), 60 << 20)

    weighted, logits = pl.pallas_call(
        _soft_obj_attention_kernel,
        grid=grid,
        in_specs=[
            pl.BlockSpec((tb, 1, Q), lambda i: (i, 0, 0)),
            pl.BlockSpec((Q, C), lambda i: (0, 0)),
            pl.BlockSpec((tn, K, C), lambda i: (i, 0, 0)),
        ],
        out_specs=[
            pl.BlockSpec((tn, 1, C), lambda i: (i, 0, 0)),
            pl.BlockSpec((tn, 1, K), lambda i: (i, 0, 0)),
        ],
        out_shape=(
            jax.ShapeDtypeStruct((N, 1, C), jnp.float32),
            jax.ShapeDtypeStruct((N, 1, K), jnp.float32),
        ),
        compiler_params=pltpu.CompilerParams(**cp),
    )(h3, w_in_t, ctx_flat)

    # (N,1,C)->(B,M,C) and (N,1,K)->(B,M,K): identical row-major order => free.
    return weighted.reshape(B, M, C), logits.reshape(B, M, K)


# ----------------------------------------------------------------------------
# Pure-JAX reference (mirrors the PyTorch forward, mask=None)
# ----------------------------------------------------------------------------
def _soft_obj_attention_ref(h, context, w_in):
    B, M, K, C = context.shape
    target = h @ w_in.T                                   # (B, C)
    tgt = jnp.repeat(target, M, axis=0)                   # (B*M, C)
    ctx = context.reshape(B * M, K, C)
    logit = jnp.einsum("nkc,nc->nk", ctx, tgt)            # (B*M, K)
    attn = jax.nn.softmax(logit, axis=-1)
    weighted = jnp.einsum("nk,nkc->nc", attn, ctx)        # (B*M, C)
    return weighted.reshape(B, M, C), logit.reshape(B, M, K)


# ----------------------------------------------------------------------------
if __name__ == "__main__":
    # context: (batch, max_cand, n_obj, ctx_dim);  h: (batch, query_dim)
    B, M, K = 2, 8, 16          # batch, max_cand, n_obj
    Q, C = 32, 128              # query_dim (hidden), ctx_dim (object feature)

    key = jax.random.PRNGKey(0)
    k_h, k_c, k_w = jax.random.split(key, 3)
    h = jax.random.normal(k_h, (B, Q), jnp.float32)
    context = jax.random.normal(k_c, (B, M, K, C), jnp.float32)
    w_in = jax.random.uniform(k_w, (C, Q), jnp.float32, -0.1, 0.1)  # linear_in.weight

    fwd = jax.jit(soft_obj_attention)
    weighted, attn_logits = fwd(h, context, w_in)
    weighted, attn_logits = jax.block_until_ready((weighted, attn_logits))
    assert weighted.shape == (B, M, C), weighted.shape
    assert attn_logits.shape == (B, M, K), attn_logits.shape

    w_ref, l_ref = _soft_obj_attention_ref(h, context, w_in)
    assert jnp.allclose(weighted, w_ref, atol=1e-4, rtol=1e-4), (
        float(jnp.max(jnp.abs(weighted - w_ref))))
    assert jnp.allclose(attn_logits, l_ref, atol=1e-4, rtol=1e-4), (
        float(jnp.max(jnp.abs(attn_logits - l_ref))))

    print("KERNEL_OK")
</pallas_src>

<mosaic_0001>
module attributes {stable_mosaic.version = 11 : i64} {
  func.func @_soft_obj_attention_kernel(%arg0: i32, %arg1: memref<2x1x32xf32, #tpu.memory_space<vmem>>, %arg2: memref<32x128xf32, #tpu.memory_space<vmem>>, %arg3: memref<16x16x128xf32, #tpu.memory_space<vmem>>, %arg4: memref<16x1x128xf32, #tpu.memory_space<vmem>>, %arg5: memref<16x1x16xf32, #tpu.memory_space<vmem>>) attributes {dimension_semantics = [#tpu.dimension_semantics<parallel>], iteration_bounds = array<i64: 1>, scalar_prefetch = 0 : i64, scratch_operands = 0 : i64, tpu.core_type = #tpu.core_type<tc>, window_params = [{transform_indices = @transform_0, window_bounds = array<i64: 2, 1, 32>}, {pipeline_mode = #tpu.pipeline_mode<synchronous>, transform_indices = @transform_1, window_bounds = array<i64: 32, 128>}, {transform_indices = @transform_2, window_bounds = array<i64: 16, 16, 128>}, {transform_indices = @transform_3, window_bounds = array<i64: 16, 1, 128>}, {transform_indices = @transform_4, window_bounds = array<i64: 16, 1, 16>}]} {
    %c0 = arith.constant 0 : index
    %c0_0 = arith.constant 0 : index
    %c0_1 = arith.constant 0 : index
    %0 = vector.load %arg3[%c0, %c0_0, %c0_1] : memref<16x16x128xf32, #tpu.memory_space<vmem>>, vector<16x16x128xf32>
    %c0_2 = arith.constant 0 : index
    %c0_3 = arith.constant 0 : index
    %c0_4 = arith.constant 0 : index
    %1 = vector.load %arg1[%c0_2, %c0_3, %c0_4] : memref<2x1x32xf32, #tpu.memory_space<vmem>>, vector<2x1x32xf32>
    %2 = vector.shape_cast %1 : vector<2x1x32xf32> to vector<2x32xf32>
    %c0_5 = arith.constant 0 : index
    %c0_6 = arith.constant 0 : index
    %3 = vector.load %arg2[%c0_5, %c0_6] : memref<32x128xf32, #tpu.memory_space<vmem>>, vector<32x128xf32>
    %cst = arith.constant dense<0.000000e+00> : vector<2x128xf32>
    %4 = tpu.matmul %2, %3, %cst {dimension_numbers = #tpu.dot_dimension_numbers<[1], [0], [0], [1], [0, 0, 1, 1], [], []>} : vector<2x32xf32>, vector<32x128xf32>, vector<2x128xf32> -> vector<2x128xf32>
    %5 = vector.shape_cast %4 : vector<2x128xf32> to vector<2x1x1x128xf32>
    %6 = vector.shape_cast %5 : vector<2x1x1x128xf32> to vector<2x1x1x128xf32>
    %7 = vector.broadcast %6 : vector<2x1x1x128xf32> to vector<2x8x1x128xf32>
    %8 = vector.shape_cast %7 : vector<2x8x1x128xf32> to vector<16x1x128xf32>
    "tpu.trace_start"() <{level = 10 : i32, message = "nqc,nkc->nqk"}> : () -> ()
    %cst_7 = arith.constant dense<0.000000e+00> : vector<16x1x16xf32>
    %9 = tpu.matmul %8, %0, %cst_7 {dimension_numbers = #tpu.dot_dimension_numbers<[2], [2], [1], [1], [0, 0, 0, 1, 1, 1], [0], [0]>} : vector<16x1x128xf32>, vector<16x16x128xf32>, vector<16x1x16xf32> -> vector<16x1x16xf32>
    "tpu.trace_stop"() : () -> ()
    %c0_8 = arith.constant 0 : index
    %c0_9 = arith.constant 0 : index
    %c0_10 = arith.constant 0 : index
    %10 = vector.load %arg5[%c0_8, %c0_9, %c0_10] : memref<16x1x16xf32, #tpu.memory_space<vmem>>, vector<16x1x16xf32>
    tpu.vector_store %arg5[%c0_8, %c0_9, %c0_10], %9 {strides = array<i32>} : memref<16x1x16xf32, #tpu.memory_space<vmem>>, vector<16x1x16xf32>,
    %cst_11 = arith.constant dense<0xFF800000> : vector<16x1xf32>
    %11 = vector.multi_reduction <maximumf>, %9, %cst_11 [2] : vector<16x1x16xf32> to vector<16x1xf32>
    %12 = vector.shape_cast %11 : vector<16x1xf32> to vector<16x1x1xf32>
    %13 = vector.broadcast %12 : vector<16x1x1xf32> to vector<16x1x16xf32>
    %14 = arith.subf %9, %13 : vector<16x1x16xf32>
    %15 = math.exp %14 : vector<16x1x16xf32>
    %cst_12 = arith.constant dense<0.000000e+00> : vector<16x1xf32>
    %16 = vector.multi_reduction <add>, %15, %cst_12 [2] : vector<16x1x16xf32> to vector<16x1xf32>
    %17 = vector.shape_cast %16 : vector<16x1xf32> to vector<16x1x1xf32>
    %18 = vector.broadcast %17 : vector<16x1x1xf32> to vector<16x1x16xf32>
    %19 = arith.divf %15, %18 : vector<16x1x16xf32>
    "tpu.trace_start"() <{level = 10 : i32, message = "nqk,nkc->nqc"}> : () -> ()
    %cst_13 = arith.constant dense<0.000000e+00> : vector<16x1x128xf32>
    %20 = tpu.matmul %19, %0, %cst_13 {dimension_numbers = #tpu.dot_dimension_numbers<[2], [1], [1], [2], [0, 0, 0, 1, 1, 2], [0], [0]>} : vector<16x1x16xf32>, vector<16x16x128xf32>, vector<16x1x128xf32> -> vector<16x1x128xf32>
    "tpu.trace_stop"() : () -> ()
    %c0_14 = arith.constant 0 : index
    %c0_15 = arith.constant 0 : index
    %c0_16 = arith.constant 0 : index
    %21 = vector.load %arg4[%c0_14, %c0_15, %c0_16] : memref<16x1x128xf32, #tpu.memory_space<vmem>>, vector<16x1x128xf32>
    tpu.vector_store %arg4[%c0_14, %c0_15, %c0_16], %20 {strides = array<i32>} : memref<16x1x128xf32, #tpu.memory_space<vmem>>, vector<16x1x128xf32>,
    return
  }
  func.func @transform_0(%arg0: i32) -> (i32, i32, i32) {
    %c0_i32 = arith.constant 0 : i32
    %c0_i32_0 = arith.constant 0 : i32
    %c0_i32_1 = arith.constant 0 : i32
    return %arg0, %c0_i32, %c0_i32_0 : i32, i32, i32
  }
  func.func @transform_1(%arg0: i32) -> (i32, i32) {
    %c0_i32 = arith.constant 0 : i32
    %c0_i32_0 = arith.constant 0 : i32
    %c0_i32_1 = arith.constant 0 : i32
    return %c0_i32, %c0_i32_0 : i32, i32
  }
  func.func @transform_2(%arg0: i32) -> (i32, i32, i32) {
    %c0_i32 = arith.constant 0 : i32
    %c0_i32_0 = arith.constant 0 : i32
    %c0_i32_1 = arith.constant 0 : i32
    return %arg0, %c0_i32, %c0_i32_0 : i32, i32, i32
  }
  func.func @transform_3(%arg0: i32) -> (i32, i32, i32) {
    %c0_i32 = arith.constant 0 : i32
    %c0_i32_0 = arith.constant 0 : i32
    %c0_i32_1 = arith.constant 0 : i32
    return %arg0, %c0_i32, %c0_i32_0 : i32, i32, i32
  }
  func.func @transform_4(%arg0: i32) -> (i32, i32, i32) {
    %c0_i32 = arith.constant 0 : i32
    %c0_i32_0 = arith.constant 0 : i32
    %c0_i32_1 = arith.constant 0 : i32
    return %arg0, %c0_i32, %c0_i32_0 : i32, i32, i32
  }
}

</mosaic_0001>

<bundles_post_ra>
// kernel: soft_obj_attention.1
= control target key start
LH: loop header
LB: loop body
LE: loop exit
PB: predicated region body
PF: predicated region fallthrough
CT: control target
= control target key end

     0   :  { %10 = vsyncpa [#allocation3], 0  ;;  %s3839_s0 = inlined_call_operand.vmem [shape: f32[2,1,32], index: 0, kind: input, shape index: {}]   ;;  %s3840_s1 = inlined_call_operand.hbm [shape: f32[32,128], index: 1, kind: input, shape index: {}]   ;;  %s3841_s2 = inlined_call_operand.hbm [shape: f32[16,16,128], index: 2, kind: input, shape index: {}]   ;;  %s3842_s3 = inlined_call_operand.hbm [shape: f32[16,1,128], index: 3, kind: output, shape index: {0}]   ;;  %s3843_s4 = inlined_call_operand.hbm [shape: f32[16,1,16], index: 4, kind: output, shape index: {1}]  }
   0x1   :  { %11 = vsyncpa [#allocation6], 0 }
   0x2   :  { %12 = vsyncpa [#allocation4], 0 }
   0x3   :  { %13 = vsyncpa [#allocation9], 0  ;;  %s3358_s15 = smov [#allocation2]   ;;  %s3262_s19 = scalar_lea.hbm %s3840_s1, 512 }
   0x4   :  { %s21_s16 = sshll.u32 %s3358_s15, 4  ;;  %p3263_p0 = scmp.ne.s32.totalorder %s3840_s1, %s3262_s19  ;;  %s22_s16 = int_to_ptr.vmem [resolvable:$true] %s21_s16 }
   0x5   :  { %p3266_p1 = scmp.lt.u32.totalorder %s3262_s19, %s3840_s1 }
   0x7   :  { %p3268_p2 = pnand %p3266_p1, %p3263_p0 }
   0x9   :  { %3271 = shalt.err (!%p3268_p2)
}
   0xa   :  { %s3272_s24 = scalar_lea.vmem %s22_s16, 512  ;;  %p3277_p4 = scmp.lt.s32.totalorder %s22_s16, %s22_s16 }
   0xb   :  { %p3273_p3 = scmp.ne.s32.totalorder %s22_s16, %s3272_s24  ;;  %p3278_p5 = scmp.lt.s32.totalorder %s3272_s24, %s3272_s24 }
   0xd   :  { %p3279_p6 = por %p3278_p5, %p3277_p4 }
   0xf   :  { %p3280_p7 = pnand %p3279_p6, %p3273_p3 }
  0x11   :  { %3283 = shalt.err (!%p3280_p7)
}
  0x12   :  { %s3359_s25 = smov 128   ;;  %s3360_s26 = smov 8  }
  0x13   :  { %27 = dma.hbm_to_vmem [thread:$0]  %s3840_s1, 512, %s22_s16, [#allocation3], %s3359_s25, %s3359_s25, %s3360_s26  }
  0x14   :  { %s3361_s29 = smov [#allocation5]   ;;  %s3284_s7 = scalar_lea.hbm %s3841_s2, 4096 }
  0x15   :  { %s33_s30 = sshll.u32 %s3361_s29, 4  ;;  %p3285_p8 = scmp.ne.s32.totalorder %s3841_s2, %s3284_s7  ;;  %s34_s30 = int_to_ptr.vmem [resolvable:$true] %s33_s30 }
  0x16   :  { %p3288_p9 = scmp.lt.u32.totalorder %s3284_s7, %s3841_s2 }
  0x18   :  { %p3290_p10 = pnand %p3288_p9, %p3285_p8 }
  0x1a   :  { %3293 = shalt.err (!%p3290_p10)
}
  0x1b   :  { %s3294_s12 = scalar_lea.vmem %s34_s30, 4096  ;;  %p3299_p12 = scmp.lt.s32.totalorder %s34_s30, %s34_s30 }
  0x1c   :  { %p3295_p11 = scmp.ne.s32.totalorder %s34_s30, %s3294_s12  ;;  %p3300_p13 = scmp.lt.s32.totalorder %s3294_s12, %s3294_s12 }
  0x1e   :  { %p3301_p0 = por %p3300_p13, %p3299_p12 }
  0x20   :  { %p3302_p1 = pnand %p3301_p0, %p3295_p11 }
  0x22   :  { %3305 = shalt.err (!%p3302_p1)
}
  0x23   :  { %39 = dma.hbm_to_vmem [thread:$0]  %s3841_s2, 4096, %s34_s30, [#allocation6], %s3359_s25, %s3359_s25, %s3360_s26  }
  0x24   :  { %3350 = dma.done.wait [#allocation3], 512  }
  0x25   :  { %3351 = vsyncadd [#allocation3], 4294966784 }
  0x26   :  { %3352 = dma.done.wait [#allocation6], 4096  }
  0x27   :  { %3353 = vsyncadd [#allocation6], 4294963200  ;;  %v90_v0 = vlaneseq  ;;  %v3362_v1 = vmov 0.0|0.0   ;;  %vm3363_vm0 = vmmov 0   ;;  %v3364_v2 = vmov 0.0   ;;  %v80_v7 = vld [vmem:[#allocation2] sm:$0xff] }
  0x28   :  { %3084 = vmatprep.subr.bf16.mxu0 %v3362_v1  ;;  %2857 = vmatprep.mubr.msk.f32.mxu0 %vm3363_vm0, %v3364_v2  ;;  %v3365_v3 = vmov 1966171168   ;;  %v81_v8 = vld [vmem:[#allocation2 + $0x8] sm:$0xff]  ;;  %v82_v9 = vld [vmem:[#allocation2 + $0x10] sm:$0xff]  ;;  %v83_v12 = vld [vmem:[#allocation2 + $0x18] sm:$0xff]  ;;  %vm101_vm1 = vcmask 261120  }
  0x29   :  { %v88_v4 = vunpack.c.l.s4 %v3365_v3  ;;  %3090 = vmatprep.subr.bf16.mxu1 %v3362_v1  ;;  %2864 = vmatprep.mubr.msk.f32.mxu1 %vm3363_vm0, %v3364_v2  ;;  %v91_v5 = vshrl.u32 %v90_v0, 7  ;;  %v3085_v11 = vpack.c.bf16 %v81_v8, %v80_v7  ;;  %v78_v13 = vld [vmem:[%s3839_s0] sm:$0x1]  ;;  %v79_v14 = vld [vmem:[%s3839_s0 + $0x1] sm:$0x1]  ;;  %v47_v17 = vld [vmem:[#allocation5 + $0x8] sm:$0xff]  ;;  %v3088_v18 = vpack.c.bf16 %v83_v12, %v82_v9 }
  0x2a   :  { %v86_v15 = vcombine.low %v78_v13, %v79_v14  ;;  %v46_v16 = vld [vmem:[#allocation5] sm:$0xff]  ;;  %v48_v22 = vld [vmem:[#allocation5 + $0x10] sm:$0xff]  ;;  %v49_v23 = vld [vmem:[#allocation5 + $0x18] sm:$0xff]  ;;  %vm1319_vm2 = vcmask 122880   ;;  %vm1512_vm3 = vcmask 130048   ;;  %s3366_s0 = smov [#allocation8]  }
  0x2b   :  { %v89_v6 = vunpack.c.0.s8 %v88_v4  ;;  %3086 = vmatpush3.bf16.msra.mxu0 %v3085_v11  ;;  %v3433_v19 = vpack.c.bf16 %v47_v17, %v46_v16  ;;  %v3443_v24 = vpack.c.bf16 %v49_v23, %v48_v22  ;;  %v50_v25 = vld [vmem:[#allocation5 + $0x20] sm:$0xff]  ;;  %v51_v26 = vld [vmem:[#allocation5 + $0x28] sm:$0xff]  ;;  %v52_v27 = vld [vmem:[#allocation5 + $0x30] sm:$0xff]  ;;  %s2714_s17 = sshll.u32 %s3366_s0, 4  ;;  %s2715_s17 = int_to_ptr.vmem [resolvable:$true] %s2714_s17 }
  0x2c   :  { %3087 = vmatprep.subr.bf16.mxu0 %v3362_v1  ;;  %v53_v28 = vld [vmem:[#allocation5 + $0x38] sm:$0xff]  ;;  %v3450_v32 = vpack.c.bf16 %v51_v26, %v50_v25  ;;  %v54_v35 = vld [vmem:[#allocation5 + $0x40] sm:$0xff]  ;;  %v55_v36 = vld [vmem:[#allocation5 + $0x48] sm:$0xff]  ;;  %s3306_s18 = scalar_lea.vmem %s2715_s17, 256  ;;  %p3311_p3 = scmp.lt.s32.totalorder %s2715_s17, %s2715_s17 }
  0x2d   :  { %v3425_v10 = vsub.s32 %v89_v6, %v91_v5  ;;  %3092 = vmatpush3.bf16.xpose.msra.mxu1 %v3433_v19  ;;  %v3452_v33 = vpack.c.bf16 %v53_v28, %v52_v27  ;;  %v56_v37 = vld [vmem:[#allocation5 + $0x50] sm:$0xff]  ;;  %v57_v38 = vld [vmem:[#allocation5 + $0x58] sm:$0xff]  ;;  %v3464_v39 = vpack.c.bf16 %v55_v36, %v54_v35  ;;  %v58_v41 = vld [vmem:[#allocation5 + $0x60] sm:$0xff]  ;;  %p3307_p2 = scmp.ne.s32.totalorder %s2715_s17, %s3306_s18  ;;  %p3312_p4 = scmp.lt.s32.totalorder %s3306_s18, %s3306_s18 }
  0x2e   :  { %3096 = vmatprep.subr.bf16.mxu1 %v3362_v1  ;;  %v3466_v40 = vpack.c.bf16 %v57_v38, %v56_v37  ;;  %v59_v42 = vld [vmem:[#allocation5 + $0x68] sm:$0xff]  ;;  %v60_v43 = vld [vmem:[#allocation5 + $0x70] sm:$0xff]  ;;  %v61_v44 = vld [vmem:[#allocation5 + $0x78] sm:$0xff] }
  0x2f   :  { %v93_v20 = vrot.slane %v86_v15, %v3425_v10  ;;  %3089 = vmatpush3.bf16.msra.mxu0 %v3088_v18  ;;  %v3476_v45 = vpack.c.bf16 %v59_v42, %v58_v41  ;;  %v3478_v46 = vpack.c.bf16 %v61_v44, %v60_v43  ;;  %v62_v47 = vld [vmem:[#allocation5 + $0x80] sm:$0xff]  ;;  %v63_v48 = vld [vmem:[#allocation5 + $0x88] sm:$0xff]  ;;  %v64_v49 = vld [vmem:[#allocation5 + $0x90] sm:$0xff]  ;;  %p3313_p5 = por %p3312_p4, %p3311_p3 }
  0x30   :  { %3093 = vmatprep.subr.bf16.mxu0 %v3362_v1  ;;  %v65_v50 = vld [vmem:[#allocation5 + $0x98] sm:$0xff]  ;;  %v3488_v51 = vpack.c.bf16 %v63_v48, %v62_v47  ;;  %v66_v53 = vld [vmem:[#allocation5 + $0xa0] sm:$0xff]  ;;  %v67_v55 = vld [vmem:[#allocation5 + $0xa8] sm:$0xff] }
  0x31   :  { %v100_v21 = vrot.slane %v93_v20, %v3425_v10  ;;  %v3490_v52 = vpack.c.bf16 %v65_v50, %v64_v49  ;;  %v68_v56 = vld [vmem:[#allocation5 + $0xb0] sm:$0xff]  ;;  %v69_v57 = vld [vmem:[#allocation5 + $0xb8] sm:$0xff]  ;;  %v3502_v58 = vpack.c.bf16 %v67_v55, %v66_v53  ;;  %v70_v61 = vld [vmem:[#allocation5 + $0xc0] sm:$0xff]  ;;  %p3314_p6 = pnand %p3313_p5, %p3307_p2 }
  0x32   :  { %v3504_v59 = vpack.c.bf16 %v69_v57, %v68_v56  ;;  %v71_v62 = vld [vmem:[#allocation5 + $0xc8] sm:$0xff]  ;;  %v72_v63 = vld [vmem:[#allocation5 + $0xd0] sm:$0xff]  ;;  %v73_v0 = vld [vmem:[#allocation5 + $0xd8] sm:$0xff] }
  0x33   :  { %2858 = vmatmul.mubr.msk.f32.vlgmr.msra.gmra.mrb[0].mxu0 %vm101_vm1, %v100_v21  ;;  %v3515_v3 = vpack.c.bf16 %v71_v62, %v70_v61  ;;  %v3517_v4 = vpack.c.bf16 %v73_v0, %v72_v63  ;;  %v74_v5 = vld [vmem:[#allocation5 + $0xe0] sm:$0xff]  ;;  %v75_v6 = vld [vmem:[#allocation5 + $0xe8] sm:$0xff]  ;;  %v76_v7 = vld [vmem:[#allocation5 + $0xf0] sm:$0xff] }
  0x34   :  { %2871 = vmatprep.mubr.msk.f32.mxu0 %vm3363_vm0, %v3364_v2  ;;  %v77_v8 = vld [vmem:[#allocation5 + $0xf8] sm:$0xff]  ;;  %v3527_v9 = vpack.c.bf16 %v75_v6, %v74_v5 }
  0x38   :  { %3095 = vmatpush3.bf16.xpose.msra.mxu0 %v3443_v24 }
  0x39   :  { %3099 = vmatprep.subr.bf16.mxu0 %v3362_v1 }
 0x106   :  { %v170_v29 = vpop.f32.mrb[0].mxu0 }
 0x107   :  { %v3448_v30 = vrot.slane %v170_v29, %v3425_v10  ;;  %v2859_v31 = vpop.f32.mrb[1].mxu0 }
 0x109   :  { %v189_v34 = vrot.slane %v3448_v30, %v3425_v10  ;;  %v182_v54 = vcombine.high %v3448_v30, %v3448_v30 }
 0x10b   :  { %2865 = vmatmul.mubr.f32.vlgmr.msra.gmra.mrb[0].mxu1 %v189_v34  ;;  %2872 = vmatmul.mubr.f32.vlgmr.msra.gmra.mrb[2].mxu0 %v189_v34  ;;  %v196_v60 = vrot.slane %v182_v54, %v3425_v10  ;;  %v3529_v10 = vpack.c.bf16 %v77_v8, %v76_v7 }
 0x10c   :  { %3098 = vmatpush3.bf16.xpose.msra.mxu1 %v3450_v32  ;;  %3101 = vmatpush3.bf16.xpose.msra.mxu0 %v3452_v33 }
 0x10d   :  { %2878 = vmatprep.mubr.msk.f32.mxu1 %vm3363_vm0, %v3364_v2  ;;  %2885 = vmatprep.mubr.msk.f32.mxu0 %vm3363_vm0, %v3364_v2 }
 0x10e   :  { %3102 = vmatprep.subr.bf16.mxu1 %v3362_v1  ;;  %3105 = vmatprep.subr.bf16.mxu0 %v3362_v1 }
 0x113   :  { %2879 = vmatmul.mubr.f32.vlgmr.msra.gmra.mrb[2].mxu1 %v189_v34  ;;  %2886 = vmatmul.mubr.f32.vlgmr.msra.gmra.mrb[4].mxu0 %v189_v34 }
 0x114   :  { %3104 = vmatpush3.bf16.xpose.msra.mxu1 %v3464_v39  ;;  %3107 = vmatpush3.bf16.xpose.msra.mxu0 %v3466_v40 }
 0x115   :  { %2892 = vmatprep.mubr.msk.f32.mxu1 %vm3363_vm0, %v3364_v2  ;;  %2899 = vmatprep.mubr.msk.f32.mxu0 %vm3363_vm0, %v3364_v2 }
 0x116   :  { %3108 = vmatprep.subr.bf16.mxu1 %v3362_v1  ;;  %3111 = vmatprep.subr.bf16.mxu0 %v3362_v1 }
 0x11b   :  { %2893 = vmatmul.mubr.f32.vlgmr.msra.gmra.mrb[4].mxu1 %v189_v34  ;;  %2900 = vmatmul.mubr.f32.vlgmr.msra.gmra.mrb[6].mxu0 %v189_v34 }
 0x11c   :  { %3110 = vmatpush3.bf16.xpose.msra.mxu1 %v3476_v45  ;;  %3113 = vmatpush3.bf16.xpose.msra.mxu0 %v3478_v46 }
 0x11d   :  { %2906 = vmatprep.mubr.msk.f32.mxu1 %vm3363_vm0, %v3364_v2  ;;  %2913 = vmatprep.mubr.msk.f32.mxu0 %vm3363_vm0, %v3364_v2 }
 0x11e   :  { %3114 = vmatprep.subr.bf16.mxu1 %v3362_v1  ;;  %3117 = vmatprep.subr.bf16.mxu0 %v3362_v1 }
 0x123   :  { %2907 = vmatmul.mubr.f32.vlgmr.msra.gmra.mrb[6].mxu1 %v189_v34  ;;  %2914 = vmatmul.mubr.f32.vlgmr.msra.gmra.mrb[8].mxu0 %v189_v34 }
 0x124   :  { %3116 = vmatpush3.bf16.xpose.msra.mxu1 %v3488_v51  ;;  %3119 = vmatpush3.bf16.xpose.msra.mxu0 %v3490_v52 }
 0x125   :  { %2920 = vmatprep.mubr.msk.f32.mxu1 %vm3363_vm0, %v3364_v2  ;;  %2927 = vmatprep.mubr.msk.f32.mxu0 %vm3363_vm0, %v3364_v2 }
 0x126   :  { %3120 = vmatprep.subr.bf16.mxu1 %v3362_v1  ;;  %3123 = vmatprep.subr.bf16.mxu0 %v3362_v1 }
 0x12b   :  { %2921 = vmatmul.mubr.f32.vlgmr.msra.gmra.mrb[8].mxu1 %v196_v60  ;;  %2928 = vmatmul.mubr.f32.vlgmr.msra.gmra.mrb[10].mxu0 %v196_v60 }
 0x12c   :  { %3122 = vmatpush3.bf16.xpose.msra.mxu1 %v3502_v58  ;;  %3125 = vmatpush3.bf16.xpose.msra.mxu0 %v3504_v59 }
 0x12d   :  { %2934 = vmatprep.mubr.msk.f32.mxu1 %vm3363_vm0, %v3364_v2  ;;  %2941 = vmatprep.mubr.msk.f32.mxu0 %vm3363_vm0, %v3364_v2 }
 0x12e   :  { %3126 = vmatprep.subr.bf16.mxu1 %v3362_v1  ;;  %3129 = vmatprep.subr.bf16.mxu0 %v3362_v1 }
 0x133   :  { %2935 = vmatmul.mubr.f32.vlgmr.msra.gmra.mrb[10].mxu1 %v196_v60  ;;  %2942 = vmatmul.mubr.f32.vlgmr.msra.gmra.mrb[12].mxu0 %v196_v60 }
 0x134   :  { %3128 = vmatpush3.bf16.xpose.msra.mxu1 %v3515_v3  ;;  %3131 = vmatpush3.bf16.xpose.msra.mxu0 %v3517_v4 }
 0x135   :  { %2948 = vmatprep.mubr.msk.f32.mxu1 %vm3363_vm0, %v3364_v2  ;;  %2955 = vmatprep.mubr.msk.f32.mxu0 %vm3363_vm0, %v3364_v2 }
 0x136   :  { %3132 = vmatprep.subr.bf16.mxu1 %v3362_v1  ;;  %3135 = vmatprep.subr.bf16.mxu0 %v3362_v1 }
 0x13b   :  { %2949 = vmatmul.mubr.f32.vlgmr.msra.gmra.mrb[12].mxu1 %v196_v60  ;;  %2956 = vmatmul.mubr.f32.vlgmr.msra.gmra.mrb[14].mxu0 %v196_v60 }
 0x13c   :  { %3134 = vmatpush3.bf16.xpose.msra.mxu1 %v3527_v9  ;;  %3137 = vmatpush3.bf16.xpose.msra.mxu0 %v3529_v10 }
 0x13d   :  { %2962 = vmatprep.mubr.msk.f32.mxu1 %vm3363_vm0, %v3364_v2  ;;  %2969 = vmatprep.mubr.msk.f32.mxu0 %vm3363_vm0, %v3364_v2 }
 0x13e   :  { %3138 = vmatprep.subr.bf16.mxu1 %v3362_v1  ;;  %3144 = vmatprep.subr.bf16.mxu0 %v3362_v1 }
 0x143   :  { %2963 = vmatmul.mubr.f32.vlgmr.msra.gmra.mrb[14].mxu1 %v196_v60  ;;  %2970 = vmatmul.mubr.f32.vlgmr.msra.gmra.mrb[16].mxu0 %v196_v60 }
 0x144   :  { %3140 = vmatpush3.bf16.msra.mxu1 %v3433_v19  ;;  %2976 = vmatprep.mubr.msk.f32.mxu1 %vm3363_vm0, %v3364_v2 }
 0x145   :  { %3141 = vmatprep.subr.bf16.mxu1 %v3362_v1  ;;  %3146 = vmatpush3.bf16.msra.mxu0 %v3450_v32 }
 0x146   :  { %2990 = vmatprep.mubr.msk.f32.mxu0 %vm3363_vm0, %v3364_v2  ;;  %3150 = vmatprep.subr.bf16.mxu0 %v3362_v1 }
 0x1de   :  { %v3547_v11 = vpop.f32.mrb[0].mxu1  ;;  %v3549_v12 = vpop.f32.mrb[2].mxu0 }
 0x1df   :  { %1320 = vst.msk [vmem:[#allocation8] sm:$0x1] %vm1319_vm2, %v3547_v11  ;;  %1321 = vst.msk [vmem:[#allocation8 + $0x1] sm:$0x1] %vm1319_vm2, %v3549_v12  ;;  %v2866_v13 = vpop.f32.mrb[1].mxu1  ;;  %v2873_v14 = vpop.f32.mrb[3].mxu0 }
 0x1e0   :  { %v1336_v15 = vsel %vm1319_vm2, %v3547_v11, -inf  ;;  %v1339_v16 = vsel %vm1319_vm2, %v3549_v12, -inf }
 0x1e1   :  { %1337 = vmax.xlane.f32.xlu0 %v1336_v15 }
 0x1e5   :  { %1340 = vmax.xlane.f32.xlu0 %v1339_v16 }
 0x1e6   :  { %v3559_v17 = vpop.f32.mrb[2].mxu1  ;;  %v3561_v18 = vpop.f32.mrb[4].mxu0 }
 0x1e7   :  { %1322 = vst.msk [vmem:[#allocation8 + $0x2] sm:$0x1] %vm1319_vm2, %v3559_v17  ;;  %1323 = vst.msk [vmem:[#allocation8 + $0x3] sm:$0x1] %vm1319_vm2, %v3561_v18  ;;  %v2880_v19 = vpop.f32.mrb[3].mxu1  ;;  %v2887_v20 = vpop.f32.mrb[5].mxu0 }
 0x1e8   :  { %v1342_v21 = vsel %vm1319_vm2, %v3559_v17, -inf  ;;  %v1345_v22 = vsel %vm1319_vm2, %v3561_v18, -inf }
 0x1e9   :  { %1343 = vmax.xlane.f32.xlu1 %v1342_v21 }
 0x1ed   :  { %1346 = vmax.xlane.f32.xlu1 %v1345_v22 }
 0x1ee   :  { %v3571_v23 = vpop.f32.mrb[4].mxu1  ;;  %v3573_v25 = vpop.f32.mrb[6].mxu0 }
 0x1ef   :  { %1324 = vst.msk [vmem:[#allocation8 + $0x4] sm:$0x1] %vm1319_vm2, %v3571_v23  ;;  %1325 = vst.msk [vmem:[#allocation8 + $0x5] sm:$0x1] %vm1319_vm2, %v3573_v25  ;;  %v2894_v26 = vpop.f32.mrb[5].mxu1  ;;  %v2901_v27 = vpop.f32.mrb[7].mxu0 }
 0x1f0   :  { %v1351_v28 = vsel %vm1319_vm2, %v3573_v25, -inf  ;;  %v1348_v29 = vsel %vm1319_vm2, %v3571_v23, -inf }
 0x1f1   :  { %1352 = vmax.xlane.f32.xlu1 %v1351_v28  ;;  %1349 = vmax.xlane.f32.xlu0 %v1348_v29 }
 0x1f6   :  { %v3583_v30 = vpop.f32.mrb[6].mxu1  ;;  %v3585_v31 = vpop.f32.mrb[8].mxu0 }
 0x1f7   :  { %1326 = vst.msk [vmem:[#allocation8 + $0x6] sm:$0x1] %vm1319_vm2, %v3583_v30  ;;  %1327 = vst.msk [vmem:[#allocation8 + $0x7] sm:$0x1] %vm1319_vm2, %v3585_v31  ;;  %v2908_v32 = vpop.f32.mrb[7].mxu1  ;;  %v2915_v34 = vpop.f32.mrb[9].mxu0 }
 0x1f8   :  { %v1357_v35 = vsel %vm1319_vm2, %v3585_v31, -inf  ;;  %v1354_v36 = vsel %vm1319_vm2, %v3583_v30, -inf }
 0x1f9   :  { %1358 = vmax.xlane.f32.xlu1 %v1357_v35  ;;  %1355 = vmax.xlane.f32.xlu0 %v1354_v36 }
 0x1fe   :  { %v3595_v37 = vpop.f32.mrb[8].mxu1  ;;  %v3597_v38 = vpop.f32.mrb[10].mxu0 }
 0x1ff   :  { %1328 = vst.msk [vmem:[#allocation8 + $0x8] sm:$0x1] %vm1319_vm2, %v3595_v37  ;;  %1329 = vst.msk [vmem:[#allocation8 + $0x9] sm:$0x1] %vm1319_vm2, %v3597_v38  ;;  %v2922_v41 = vpop.f32.mrb[9].mxu1  ;;  %v2929_v42 = vpop.f32.mrb[11].mxu0 }
 0x200   :  { %v1363_v43 = vsel %vm1319_vm2, %v3597_v38, -inf  ;;  %v1360_v44 = vsel %vm1319_vm2, %v3595_v37, -inf }
 0x201   :  { %1364 = vmax.xlane.f32.xlu1 %v1363_v43  ;;  %1361 = vmax.xlane.f32.xlu0 %v1360_v44 }
 0x206   :  { %v3607_v47 = vpop.f32.mrb[10].mxu1  ;;  %v3609_v48 = vpop.f32.mrb[12].mxu0 }
 0x207   :  { %1330 = vst.msk [vmem:[#allocation8 + $0xa] sm:$0x1] %vm1319_vm2, %v3607_v47  ;;  %1331 = vst.msk [vmem:[#allocation8 + $0xb] sm:$0x1] %vm1319_vm2, %v3609_v48  ;;  %v2936_v49 = vpop.f32.mrb[11].mxu1  ;;  %v2943_v50 = vpop.f32.mrb[13].mxu0 }
 0x208   :  { %v1369_v53 = vsel %vm1319_vm2, %v3609_v48, -inf  ;;  %v1366_v54 = vsel %vm1319_vm2, %v3607_v47, -inf }
 0x209   :  { %1370 = vmax.xlane.f32.xlu1 %v1369_v53  ;;  %1367 = vmax.xlane.f32.xlu0 %v1366_v54 }
 0x20e   :  { %v3619_v55 = vpop.f32.mrb[12].mxu1  ;;  %v3621_v56 = vpop.f32.mrb[14].mxu0 }
 0x20f   :  { %1332 = vst.msk [vmem:[#allocation8 + $0xc] sm:$0x1] %vm1319_vm2, %v3619_v55  ;;  %1333 = vst.msk [vmem:[#allocation8 + $0xd] sm:$0x1] %vm1319_vm2, %v3621_v56  ;;  %v2950_v57 = vpop.f32.mrb[13].mxu1  ;;  %v2957_v60 = vpop.f32.mrb[15].mxu0 }
 0x210   :  { %v1375_v61 = vsel %vm1319_vm2, %v3621_v56, -inf  ;;  %v1372_v62 = vsel %vm1319_vm2, %v3619_v55, -inf }
 0x211   :  { %1376 = vmax.xlane.f32.xlu1 %v1375_v61  ;;  %1373 = vmax.xlane.f32.xlu0 %v1372_v62 }
 0x216   :  { %v3631_v63 = vpop.f32.mrb[14].mxu1  ;;  %v3633_v0 = vpop.f32.mrb[16].mxu0 }
 0x217   :  { %1334 = vst.msk [vmem:[#allocation8 + $0xe] sm:$0x1] %vm1319_vm2, %v3631_v63  ;;  %1335 = vst.msk [vmem:[#allocation8 + $0xf] sm:$0x1] %vm1319_vm2, %v3633_v0  ;;  %v2964_v5 = vpop.f32.mrb[15].mxu1  ;;  %v2971_v6 = vpop.f32.mrb[17].mxu0 }
 0x218   :  { %v1381_v7 = vsel %vm1319_vm2, %v3633_v0, -inf  ;;  %v1378_v8 = vsel %vm1319_vm2, %v3631_v63, -inf }
 0x219   :  { %1382 = vmax.xlane.f32.xlu1 %v1381_v7  ;;  %1379 = vmax.xlane.f32.xlu0 %v1378_v8 }
 0x26e   :  { %v1338_v13 = vpop.xlane.xlu0 %1337 }
 0x26f   :  { %v1384_v14 = vsub.f32 %v3547_v11, %v1338_v13 }
 0x271   :  { %v1400_v15 = vmul.f32 1.442695, %v1384_v14 }
 0x272   :  { %v1341_v16 = vpop.xlane.xlu0 %1340 }
 0x273   :  { %3198 = vpow2.f32 %v1400_v15  ;;  %v1385_v19 = vsub.f32 %v3549_v12, %v1341_v16 }
 0x275   :  { %v1402_v20 = vmul.f32 1.442695, %v1385_v19 }
 0x276   :  { %v1344_v21 = vpop.xlane.xlu1 %1343 }
 0x277   :  { %3200 = vpow2.f32 %v1402_v20  ;;  %v1386_v22 = vsub.f32 %v3559_v17, %v1344_v21 }
 0x279   :  { %v1404_v26 = vmul.f32 1.442695, %v1386_v22 }
 0x27a   :  { %v1347_v27 = vpop.xlane.xlu1 %1346 }
 0x27b   :  { %3202 = vpow2.f32 %v1404_v26  ;;  %v1387_v28 = vsub.f32 %v3561_v18, %v1347_v27 }
 0x27d   :  { %v3647_v29 = vpop.eup %3198  ;;  %v1406_v32 = vmul.f32 1.442695, %v1387_v28 }
 0x27e   :  { %v1353_v34 = vpop.xlane.xlu1 %1352  ;;  %v1350_v11 = vpop.xlane.xlu0 %1349  ;;  %v1432_v35 = vsel %vm1319_vm2, %v3647_v29, 0.0 }
 0x27f   :  { %3204 = vpow2.f32 %v1406_v32  ;;  %v1389_v12 = vsub.f32 %v3573_v25, %v1353_v34  ;;  %v1388_v36 = vsub.f32 %v3571_v23, %v1350_v11  ;;  %1433 = vadd.xlane.f32.xlu0 %v1432_v35 }
 0x281   :  { %v3653_v17 = vpop.eup %3200  ;;  %v1410_v41 = vmul.f32 1.442695, %v1389_v12  ;;  %v1408_v42 = vmul.f32 1.442695, %v1388_v36 }
 0x282   :  { %v1435_v18 = vsel %vm1319_vm2, %v3653_v17, 0.0 }
 0x283   :  { %3206 = vpow2.f32 %v1410_v41  ;;  %1436 = vadd.xlane.f32.xlu1 %v1435_v18 }
 0x284   :  { %3208 = vpow2.f32 %v1408_v42 }
 0x285   :  { %v3657_v43 = vpop.eup %3202 }
 0x286   :  { %v1359_v44 = vpop.xlane.xlu1 %1358  ;;  %v1356_v49 = vpop.xlane.xlu0 %1355  ;;  %v1438_v25 = vsel %vm1319_vm2, %v3657_v43, 0.0 }
 0x287   :  { %v1391_v23 = vsub.f32 %v3585_v31, %v1359_v44  ;;  %v1390_v50 = vsub.f32 %v3583_v30, %v1356_v49  ;;  %1439 = vadd.xlane.f32.xlu0 %v1438_v25 }
 0x289   :  { %v3663_v53 = vpop.eup %3204  ;;  %v1414_v54 = vmul.f32 1.442695, %v1391_v23  ;;  %v1412_v57 = vmul.f32 1.442695, %v1390_v50 }
 0x28a   :  { %v1441_v60 = vsel %vm1319_vm2, %v3663_v53, 0.0 }
 0x28b   :  { %3210 = vpow2.f32 %v1414_v54  ;;  %1442 = vadd.xlane.f32.xlu1 %v1441_v60 }
 0x28c   :  { %3212 = vpow2.f32 %v1412_v57 }
 0x28d   :  { %v3667_v61 = vpop.eup %3206 }
 0x28e   :  { %v3669_v62 = vpop.eup %3208  ;;  %v1365_v5 = vpop.xlane.xlu1 %1364  ;;  %v1447_v30 = vsel %vm1319_vm2, %v3667_v61, 0.0 }
 0x28f   :  { %v1362_v6 = vpop.xlane.xlu0 %1361  ;;  %v1393_v31 = vsub.f32 %v3597_v38, %v1365_v5  ;;  %1448 = vadd.xlane.f32.xlu1 %v1447_v30  ;;  %v1444_v8 = vsel %vm1319_vm2, %v3669_v62, 0.0 }
 0x290   :  { %v1392_v7 = vsub.f32 %v3595_v37, %v1362_v6  ;;  %1445 = vadd.xlane.f32.xlu0 %v1444_v8 }
 0x291   :  { %v1418_v13 = vmul.f32 1.442695, %v1393_v31 }
 0x292   :  { %v1416_v14 = vmul.f32 1.442695, %v1392_v7 }
 0x293   :  { %3214 = vpow2.f32 %v1418_v13 }
 0x294   :  { %3216 = vpow2.f32 %v1416_v14 }
 0x295   :  { %v3677_v15 = vpop.eup %3210 }
 0x296   :  { %v3679_v16 = vpop.eup %3212  ;;  %v1371_v19 = vpop.xlane.xlu1 %1370  ;;  %v1453_v38 = vsel %vm1319_vm2, %v3677_v15, 0.0 }
 0x297   :  { %v1368_v20 = vpop.xlane.xlu0 %1367  ;;  %v1395_v37 = vsub.f32 %v3609_v48, %v1371_v19  ;;  %1454 = vadd.xlane.f32.xlu1 %v1453_v38  ;;  %v1450_v22 = vsel %vm1319_vm2, %v3679_v16, 0.0 }
 0x298   :  { %v1394_v21 = vsub.f32 %v3607_v47, %v1368_v20  ;;  %1451 = vadd.xlane.f32.xlu0 %v1450_v22 }
 0x299   :  { %v1422_v26 = vmul.f32 1.442695, %v1395_v37 }
 0x29a   :  { %v1420_v27 = vmul.f32 1.442695, %v1394_v21 }
 0x29b   :  { %3218 = vpow2.f32 %v1422_v26 }
 0x29c   :  { %3220 = vpow2.f32 %v1420_v27 }
 0x29d   :  { %v3687_v28 = vpop.eup %3214 }
 0x29e   :  { %v3689_v32 = vpop.eup %3216  ;;  %v1377_v34 = vpop.xlane.xlu1 %1376  ;;  %v1459_v48 = vsel %vm1319_vm2, %v3687_v28, 0.0 }
 0x29f   :  { %v1374_v11 = vpop.xlane.xlu0 %1373  ;;  %v1397_v47 = vsub.f32 %v3621_v56, %v1377_v34  ;;  %1460 = vadd.xlane.f32.xlu1 %v1459_v48  ;;  %v1456_v12 = vsel %vm1319_vm2, %v3689_v32, 0.0 }
 0x2a0   :  { %v1396_v35 = vsub.f32 %v3619_v55, %v1374_v11  ;;  %1457 = vadd.xlane.f32.xlu0 %v1456_v12 }
 0x2a1   :  { %v1426_v36 = vmul.f32 1.442695, %v1397_v47 }
 0x2a2   :  { %v1424_v41 = vmul.f32 1.442695, %v1396_v35 }
 0x2a3   :  { %3222 = vpow2.f32 %v1426_v36 }
 0x2a4   :  { %3224 = vpow2.f32 %v1424_v41 }
 0x2a5   :  { %v3697_v42 = vpop.eup %3218 }
 0x2a6   :  { %v3699_v18 = vpop.eup %3220  ;;  %v1383_v44 = vpop.xlane.xlu1 %1382  ;;  %v1465_v56 = vsel %vm1319_vm2, %v3697_v42, 0.0 }
 0x2a7   :  { %v1380_v49 = vpop.xlane.xlu0 %1379  ;;  %v1399_v55 = vsub.f32 %v3633_v0, %v1383_v44  ;;  %1466 = vadd.xlane.f32.xlu1 %v1465_v56  ;;  %v1462_v23 = vsel %vm1319_vm2, %v3699_v18, 0.0 }
 0x2a8   :  { %v1398_v25 = vsub.f32 %v3631_v63, %v1380_v49  ;;  %1463 = vadd.xlane.f32.xlu0 %v1462_v23 }
 0x2a9   :  { %v1430_v50 = vmul.f32 1.442695, %v1399_v55 }
 0x2aa   :  { %v1428_v54 = vmul.f32 1.442695, %v1398_v25 }
 0x2ab   :  { %3226 = vpow2.f32 %v1430_v50 }
 0x2ac   :  { %3228 = vpow2.f32 %v1428_v54 }
 0x2ad   :  { %v3707_v57 = vpop.eup %3222 }
 0x2ae   :  { %v3709_v60 = vpop.eup %3224  ;;  %v1471_v5 = vsel %vm1319_vm2, %v3707_v57, 0.0 }
 0x2af   :  { %1472 = vadd.xlane.f32.xlu1 %v1471_v5  ;;  %v1468_v63 = vsel %vm1319_vm2, %v3709_v60, 0.0 }
 0x2b0   :  { %1469 = vadd.xlane.f32.xlu0 %v1468_v63 }
 0x2b5   :  { %v3715_v0 = vpop.eup %3226 }
 0x2b6   :  { %v3717_v6 = vpop.eup %3228  ;;  %v1477_v30 = vsel %vm1319_vm2, %v3715_v0, 0.0 }
 0x2b7   :  { %1478 = vadd.xlane.f32.xlu1 %v1477_v30  ;;  %v1474_v31 = vsel %vm1319_vm2, %v3717_v6, 0.0 }
 0x2b8   :  { %1475 = vadd.xlane.f32.xlu0 %v1474_v31 }
 0x30c   :  { %v1434_v7 = vpop.xlane.xlu0 %1433 }
 0x30d   :  { %3230 = vrcp.f32 %v1434_v7 }
 0x310   :  { %v1437_v8 = vpop.xlane.xlu1 %1436 }
 0x311   :  { %3232 = vrcp.f32 %v1437_v8 }
 0x314   :  { %v1440_v13 = vpop.xlane.xlu0 %1439 }
 0x315   :  { %3234 = vrcp.f32 %v1440_v13 }
 0x317   :  { %v3231_v14 = vpop.eup %3230 }
 0x318   :  { %v1481_v19 = vmul.f32 %v3231_v14, %v3647_v29  ;;  %v1443_v20 = vpop.xlane.xlu1 %1442 }
 0x319   :  { %3236 = vrcp.f32 %v1443_v20 }
 0x31a   :  { %2977 = vmatmul.mubr.msk.f32.vlgmr.msra.gmra.mrb[16].mxu1 %vm1512_vm3, %v1481_v19 }
 0x31b   :  { %v3233_v38 = vpop.eup %3232  ;;  %3143 = vmatpush3.bf16.msra.mxu1 %v3443_v24  ;;  %2983 = vmatprep.mubr.msk.f32.mxu1 %vm3363_vm0, %v3364_v2 }
 0x31c   :  { %v1483_v37 = vmul.f32 %v3233_v38, %v3653_v17  ;;  %v1449_v21 = vpop.xlane.xlu1 %1448  ;;  %3147 = vmatprep.subr.bf16.mxu1 %v3362_v1 }
 0x31d   :  { %3238 = vrcp.f32 %v1449_v21  ;;  %v1446_v22 = vpop.xlane.xlu0 %1445 }
 0x31e   :  { %3240 = vrcp.f32 %v1446_v22  ;;  %2984 = vmatmul.mubr.msk.f32.vlgmr.msra.gmra.mrb[18].mxu1 %vm1512_vm3, %v1483_v37 }
 0x31f   :  { %v3235_v29 = vpop.eup %3234  ;;  %3149 = vmatpush3.bf16.msra.mxu1 %v3452_v33  ;;  %2997 = vmatprep.mubr.msk.f32.mxu1 %vm3363_vm0, %v3364_v2 }
 0x320   :  { %v1485_v24 = vmul.f32 %v3235_v29, %v3657_v43  ;;  %3153 = vmatprep.subr.bf16.mxu1 %v3362_v1 }
 0x322   :  { %2991 = vmatmul.mubr.msk.f32.vlgmr.msra.gmra.mrb[18].mxu0 %vm1512_vm3, %v1485_v24 }
 0x323   :  { %v3237_v17 = vpop.eup %3236  ;;  %3152 = vmatpush3.bf16.msra.mxu0 %v3464_v39  ;;  %3004 = vmatprep.mubr.msk.f32.mxu0 %vm3363_vm0, %v3364_v2 }
 0x324   :  { %v1487_v26 = vmul.f32 %v3237_v17, %v3663_v53  ;;  %v1455_v27 = vpop.xlane.xlu1 %1454  ;;  %3156 = vmatprep.subr.bf16.mxu0 %v3362_v1 }
 0x325   :  { %3242 = vrcp.f32 %v1455_v27  ;;  %v1452_v33 = vpop.xlane.xlu0 %1451 }
 0x326   :  { %3244 = vrcp.f32 %v1452_v33  ;;  %2998 = vmatmul.mubr.msk.f32.vlgmr.msra.gmra.mrb[20].mxu1 %vm1512_vm3, %v1487_v26 }
 0x327   :  { %v3239_v43 = vpop.eup %3238  ;;  %3155 = vmatpush3.bf16.msra.mxu1 %v3466_v40  ;;  %3011 = vmatprep.mubr.msk.f32.mxu1 %vm3363_vm0, %v3364_v2 }
 0x328   :  { %v3241_v39 = vpop.eup %3240  ;;  %v1491_v34 = vmul.f32 %v3239_v43, %v3667_v61  ;;  %3159 = vmatprep.subr.bf16.mxu1 %v3362_v1 }
 0x329   :  { %v1489_v53 = vmul.f32 %v3241_v39, %v3669_v62 }
 0x32a   :  { %3012 = vmatmul.mubr.msk.f32.vlgmr.msra.gmra.mrb[22].mxu1 %vm1512_vm3, %v1491_v34 }
 0x32b   :  { %3005 = vmatmul.mubr.msk.f32.vlgmr.msra.gmra.mrb[20].mxu0 %vm1512_vm3, %v1489_v53  ;;  %3161 = vmatpush3.bf16.msra.mxu1 %v3478_v46 }
 0x32c   :  { %v1461_v11 = vpop.xlane.xlu1 %1460  ;;  %3158 = vmatpush3.bf16.msra.mxu0 %v3476_v45  ;;  %3018 = vmatprep.mubr.msk.f32.mxu0 %vm3363_vm0, %v3364_v2 }
 0x32d   :  { %3246 = vrcp.f32 %v1461_v11  ;;  %v1458_v40 = vpop.xlane.xlu0 %1457  ;;  %3025 = vmatprep.mubr.msk.f32.mxu1 %vm3363_vm0, %v3364_v2  ;;  %3162 = vmatprep.subr.bf16.mxu0 %v3362_v1 }
 0x32e   :  { %3248 = vrcp.f32 %v1458_v40  ;;  %3165 = vmatprep.subr.bf16.mxu1 %v3362_v1 }
 0x32f   :  { %v3243_v61 = vpop.eup %3242 }
 0x330   :  { %v3245_v62 = vpop.eup %3244  ;;  %v1495_v46 = vmul.f32 %v3243_v61, %v3677_v15 }
 0x331   :  { %v1493_v48 = vmul.f32 %v3245_v62, %v3679_v16 }
 0x332   :  { %3026 = vmatmul.mubr.msk.f32.vlgmr.msra.gmra.mrb[24].mxu1 %vm1512_vm3, %v1495_v46 }
 0x333   :  { %3019 = vmatmul.mubr.msk.f32.vlgmr.msra.gmra.mrb[22].mxu0 %vm1512_vm3, %v1493_v48  ;;  %3167 = vmatpush3.bf16.msra.mxu1 %v3490_v52 }
 0x334   :  { %v1467_v45 = vpop.xlane.xlu1 %1466  ;;  %3164 = vmatpush3.bf16.msra.mxu0 %v3488_v51  ;;  %3032 = vmatprep.mubr.msk.f32.mxu0 %vm3363_vm0, %v3364_v2 }
 0x335   :  { %3250 = vrcp.f32 %v1467_v45  ;;  %v1464_v47 = vpop.xlane.xlu0 %1463  ;;  %3039 = vmatprep.mubr.msk.f32.mxu1 %vm3363_vm0, %v3364_v2  ;;  %3168 = vmatprep.subr.bf16.mxu0 %v3362_v1 }
 0x336   :  { %3252 = vrcp.f32 %v1464_v47  ;;  %3171 = vmatprep.subr.bf16.mxu1 %v3362_v1 }
 0x337   :  { %v3247_v15 = vpop.eup %3246 }
 0x338   :  { %v3249_v16 = vpop.eup %3248  ;;  %v1499_v52 = vmul.f32 %v3247_v15, %v3687_v28 }
 0x339   :  { %v1497_v35 = vmul.f32 %v3249_v16, %v3689_v32 }
 0x33a   :  { %3040 = vmatmul.mubr.msk.f32.vlgmr.msra.gmra.mrb[26].mxu1 %vm1512_vm3, %v1499_v52 }
 0x33b   :  { %3033 = vmatmul.mubr.msk.f32.vlgmr.msra.gmra.mrb[24].mxu0 %vm1512_vm3, %v1497_v35  ;;  %3173 = vmatpush3.bf16.msra.mxu1 %v3504_v59 }
 0x33c   :  { %v1473_v51 = vpop.xlane.xlu1 %1472  ;;  %3170 = vmatpush3.bf16.msra.mxu0 %v3502_v58  ;;  %3046 = vmatprep.mubr.msk.f32.mxu0 %vm3363_vm0, %v3364_v2 }
 0x33d   :  { %3254 = vrcp.f32 %v1473_v51  ;;  %v1470_v12 = vpop.xlane.xlu0 %1469  ;;  %3053 = vmatprep.mubr.msk.f32.mxu1 %vm3363_vm0, %v3364_v2  ;;  %3174 = vmatprep.subr.bf16.mxu0 %v3362_v1 }
 0x33e   :  { %3256 = vrcp.f32 %v1470_v12  ;;  %3177 = vmatprep.subr.bf16.mxu1 %v3362_v1 }
 0x33f   :  { %v3251_v28 = vpop.eup %3250 }
 0x340   :  { %v3253_v32 = vpop.eup %3252  ;;  %v1503_v59 = vmul.f32 %v3251_v28, %v3697_v42 }
 0x341   :  { %v1501_v36 = vmul.f32 %v3253_v32, %v3699_v18 }
 0x342   :  { %3054 = vmatmul.mubr.msk.f32.vlgmr.msra.gmra.mrb[28].mxu1 %vm1512_vm3, %v1503_v59 }
 0x343   :  { %3047 = vmatmul.mubr.msk.f32.vlgmr.msra.gmra.mrb[26].mxu0 %vm1512_vm3, %v1501_v36  ;;  %3179 = vmatpush3.bf16.msra.mxu1 %v3517_v4 }
 0x344   :  { %v1479_v58 = vpop.xlane.xlu1 %1478  ;;  %3176 = vmatpush3.bf16.msra.mxu0 %v3515_v3  ;;  %3060 = vmatprep.mubr.msk.f32.mxu0 %vm3363_vm0, %v3364_v2 }
 0x345   :  { %3258 = vrcp.f32 %v1479_v58  ;;  %v1476_v41 = vpop.xlane.xlu0 %1475  ;;  %3067 = vmatprep.mubr.msk.f32.mxu1 %vm3363_vm0, %v3364_v2  ;;  %3180 = vmatprep.subr.bf16.mxu0 %v3362_v1 }
 0x346   :  { %3260 = vrcp.f32 %v1476_v41  ;;  %3183 = vmatprep.subr.bf16.mxu1 %v3362_v1 }
 0x347   :  { %v3255_v42 = vpop.eup %3254 }
 0x348   :  { %v3257_v18 = vpop.eup %3256  ;;  %v1507_v4 = vmul.f32 %v3255_v42, %v3707_v57 }
 0x349   :  { %v1505_v44 = vmul.f32 %v3257_v18, %v3709_v60 }
 0x34a   :  { %3068 = vmatmul.mubr.msk.f32.vlgmr.msra.gmra.mrb[30].mxu1 %vm1512_vm3, %v1507_v4 }
 0x34b   :  { %3061 = vmatmul.mubr.msk.f32.vlgmr.msra.gmra.mrb[28].mxu0 %vm1512_vm3, %v1505_v44  ;;  %3185 = vmatpush3.bf16.msra.mxu1 %v3529_v10 }
 0x34c   :  { %3182 = vmatpush3.bf16.msra.mxu0 %v3527_v9  ;;  %3074 = vmatprep.mubr.msk.f32.mxu0 %vm3363_vm0, %v3364_v2 }
 0x34d   :  { %3081 = vmatprep.mubr.msk.f32.mxu1 %vm3363_vm0, %v3364_v2 }
 0x34f   :  { %v3259_v1 = vpop.eup %3258 }
 0x350   :  { %v3261_v3 = vpop.eup %3260  ;;  %v1511_v49 = vmul.f32 %v3259_v1, %v3715_v0 }
 0x351   :  { %v1509_v56 = vmul.f32 %v3261_v3, %v3717_v6 }
 0x352   :  { %3082 = vmatmul.mubr.msk.f32.vlgmr.msra.gmra.mrb[32].mxu1 %vm1512_vm3, %v1511_v49 }
 0x353   :  { %3075 = vmatmul.mubr.msk.f32.vlgmr.msra.gmra.mrb[30].mxu0 %vm1512_vm3, %v1509_v56 }
 0x354   :  { %3317 = shalt.err (!%p3314_p6)
}
 0x355   :  { %s3318_s21 = scalar_lea.hbm %s3843_s4, 256 }
 0x356   :  { %p3319_p7 = scmp.ne.s32.totalorder %s3843_s4, %s3318_s21  ;;  %p3322_p8 = scmp.lt.u32.totalorder %s3318_s21, %s3843_s4 }
 0x358   :  { %p3324_p9 = pnand %p3322_p8, %p3319_p7 }
 0x35a   :  { %3327 = shalt.err (!%p3324_p9)
}
 0x35b   :  { %s3367_s26 = smov 16   ;;  %s3368_s27 = smov 1  }
 0x35c   :  { %2720 = dma.vmem_to_hbm [thread:$0]  %s2715_s17, 256, %s3843_s4, [#allocation9], %s3367_s26, %s3367_s26, %s3368_s27  }
 0x35d   :  { %s3369_s4 = smov [#allocation7]  }
 0x35e   :  { %s2702_s30 = sshll.u32 %s3369_s4, 4  ;;  %s2703_s30 = int_to_ptr.vmem [resolvable:$true] %s2702_s30 }
 0x35f   :  { %s3328_s5 = scalar_lea.vmem %s2703_s30, 256  ;;  %p3333_p11 = scmp.lt.s32.totalorder %s2703_s30, %s2703_s30 }
 0x360   :  { %p3329_p10 = scmp.ne.s32.totalorder %s2703_s30, %s3328_s5  ;;  %p3334_p12 = scmp.lt.s32.totalorder %s3328_s5, %s3328_s5 }
 0x362   :  { %p3335_p13 = por %p3334_p12, %p3333_p11 }
 0x364   :  { %p3336_p0 = pnand %p3335_p13, %p3329_p10 }
 0x3ed   :  { %v1582_v2 = vpop.f32.mrb[16].mxu1 }
 0x3ee   :  { %2681 = vst [vmem:[#allocation7] sm:$0x1] %v1582_v2  ;;  %v2978_v9 = vpop.f32.mrb[17].mxu1 }
 0x3f1   :  { %v1655_v10 = vpop.f32.mrb[18].mxu1 }
 0x3f2   :  { %2682 = vst [vmem:[#allocation7 + $0x1] sm:$0x1] %v1655_v10  ;;  %v2985_v55 = vpop.f32.mrb[19].mxu1 }
 0x3f5   :  { %v1728_v25 = vpop.f32.mrb[18].mxu0 }
 0x3f6   :  { %2683 = vst [vmem:[#allocation7 + $0x2] sm:$0x1] %v1728_v25  ;;  %v2992_v23 = vpop.f32.mrb[19].mxu0 }
 0x3f9   :  { %v1801_v50 = vpop.f32.mrb[20].mxu1 }
 0x3fa   :  { %2684 = vst [vmem:[#allocation7 + $0x3] sm:$0x1] %v1801_v50  ;;  %v2999_v54 = vpop.f32.mrb[21].mxu1 }
 0x3fd   :  { %v1947_v57 = vpop.f32.mrb[22].mxu1 }
 0x3fe   :  { %v1874_v60 = vpop.f32.mrb[20].mxu0  ;;  %2686 = vst [vmem:[#allocation7 + $0x5] sm:$0x1] %v1947_v57  ;;  %v3013_v5 = vpop.f32.mrb[23].mxu1 }
 0x3ff   :  { %2685 = vst [vmem:[#allocation7 + $0x4] sm:$0x1] %v1874_v60  ;;  %v3006_v63 = vpop.f32.mrb[21].mxu0 }
 0x405   :  { %v2093_v0 = vpop.f32.mrb[24].mxu1 }
 0x406   :  { %v2020_v6 = vpop.f32.mrb[22].mxu0  ;;  %2688 = vst [vmem:[#allocation7 + $0x7] sm:$0x1] %v2093_v0  ;;  %v3027_v30 = vpop.f32.mrb[25].mxu1 }
 0x407   :  { %2687 = vst [vmem:[#allocation7 + $0x6] sm:$0x1] %v2020_v6  ;;  %v3020_v31 = vpop.f32.mrb[23].mxu0 }
 0x40d   :  { %v2239_v7 = vpop.f32.mrb[26].mxu1 }
 0x40e   :  { %v2166_v8 = vpop.f32.mrb[24].mxu0  ;;  %2690 = vst [vmem:[#allocation7 + $0x9] sm:$0x1] %v2239_v7  ;;  %v3041_v13 = vpop.f32.mrb[27].mxu1 }
 0x40f   :  { %2689 = vst [vmem:[#allocation7 + $0x8] sm:$0x1] %v2166_v8  ;;  %v3034_v14 = vpop.f32.mrb[25].mxu0 }
 0x415   :  { %v2385_v19 = vpop.f32.mrb[28].mxu1 }
 0x416   :  { %v2312_v20 = vpop.f32.mrb[26].mxu0  ;;  %2692 = vst [vmem:[#allocation7 + $0xb] sm:$0x1] %v2385_v19  ;;  %v3055_v38 = vpop.f32.mrb[29].mxu1 }
 0x417   :  { %2691 = vst [vmem:[#allocation7 + $0xa] sm:$0x1] %v2312_v20  ;;  %v3048_v37 = vpop.f32.mrb[27].mxu0 }
 0x41d   :  { %v2531_v21 = vpop.f32.mrb[30].mxu1 }
 0x41e   :  { %v2458_v22 = vpop.f32.mrb[28].mxu0  ;;  %2694 = vst [vmem:[#allocation7 + $0xd] sm:$0x1] %v2531_v21  ;;  %v3069_v29 = vpop.f32.mrb[31].mxu1 }
 0x41f   :  { %2693 = vst [vmem:[#allocation7 + $0xc] sm:$0x1] %v2458_v22  ;;  %v3062_v24 = vpop.f32.mrb[29].mxu0 }
 0x425   :  { %v2677_v17 = vpop.f32.mrb[32].mxu1 }
 0x426   :  { %v2604_v26 = vpop.f32.mrb[30].mxu0  ;;  %2696 = vst [vmem:[#allocation7 + $0xf] sm:$0x1] %v2677_v17  ;;  %v3083_v27 = vpop.f32.mrb[33].mxu1 }
 0x427   :  { %2695 = vst [vmem:[#allocation7 + $0xe] sm:$0x1] %v2604_v26  ;;  %v3076_v33 = vpop.f32.mrb[31].mxu0 }
 0x428   :  { %3339 = shalt.err (!%p3336_p0)
}
 0x429   :  { %s3340_s8 = scalar_lea.hbm %s3842_s3, 256 }
 0x42a   :  { %p3341_p1 = scmp.ne.s32.totalorder %s3842_s3, %s3340_s8  ;;  %p3344_p2 = scmp.lt.u32.totalorder %s3340_s8, %s3842_s3 }
 0x42c   :  { %p3346_p3 = pnand %p3344_p2, %p3341_p1 }
 0x42e   :  { %3349 = shalt.err (!%p3346_p3)
}
 0x42f   :  { %2708 = dma.vmem_to_hbm [thread:$0]  %s2703_s30, 256, %s3842_s3, [#allocation4], %s3367_s26, %s3367_s26, %s3368_s27  }
 0x430   :  { %3354 = dma.done.wait [#allocation4], 256  }
 0x431   :  { %3355 = vsyncadd [#allocation4], 4294967040 }
 0x432   :  { %3356 = dma.done.wait [#allocation9], 256  }
 0x433   :  { %3357 = vsyncadd [#allocation9], 4294967040 }
 0x434   :  { %2727 = vsyncpa [#allocation3], 1 }
 0x435   :  { %2728 = vsyncpa [#allocation6], 1 }
 0x436   :  { %2729 = vsyncpa [#allocation4], 1 }
 0x437   :  { %2730 = vsyncpa [#allocation9], 1 }

</bundles_post_ra>
